<compile_context>
chip_gen: v5e
topology: v5e:2x2
jax: 0.10.0
libtpu: 0.0.40
codegen_flags: <defaults>
</compile_context>

<pallas_src>
import math

import jax
import jax.numpy as jnp
from jax.experimental import pallas as pl
from jax.experimental.pallas import tpu as pltpu


def _proj_kernel(x_ref, w_ref, o_ref, acc_ref):
    # x_ref:   (TM, TK) tile of the flattened input
    # w_ref:   (TN, TK) tile of the weight in its natural (out_dim, in_dim) layout
    # o_ref:   (TM, TN) output tile
    # acc_ref: (TM, TN) f32 accumulator, resident across the K grid axis
    @pl.when(pl.program_id(2) == 0)
    def _init():
        acc_ref[...] = jnp.zeros_like(acc_ref)

    # y += x @ w^T : contract the last axis of both operands on the MXU,
    # accumulating in f32.
    acc_ref[...] += jax.lax.dot_general(
        x_ref[...],
        w_ref[...],
        dimension_numbers=(((1,), (1,)), ((), ())),
        preferred_element_type=jnp.float32,
    )

    @pl.when(pl.program_id(2) == pl.num_programs(2) - 1)
    def _finalize():
        o_ref[...] = acc_ref[...].astype(o_ref.dtype)


def _pick_tile(dim, target, align):
    """Largest tile <= target that is a multiple of `align` and divides `dim`;
    falls back to the full dimension (always a legal TPU block extent)."""
    if dim <= target:
        return dim
    t = (target // align) * align
    while t >= align:
        if dim % t == 0:
            return t
        t -= align
    return dim


def conv_distill_proj(x, w, *, tm=256, tn=256, tk=512):
    """x: (..., in_dim), w: (out_dim, in_dim). Returns x @ w.T with shape (..., out_dim)."""
    *lead, k_dim = x.shape
    n_dim, k_w = w.shape
    assert k_dim == k_w, "weight in_dim mismatch"
    m_dim = math.prod(lead) if lead else 1

    # Contiguous reshape only — no transposes, no extra HBM traffic.
    x2d = x.reshape(m_dim, k_dim)

    # Tile sizes respecting TPU block constraints:
    #   sublane dims: multiple of 8 (or the full dim);
    #   lane dims   : multiple of 128 (or the full dim).
    tm = _pick_tile(m_dim, tm, 8)
    tn = _pick_tile(n_dim, tn, 128)
    tk = _pick_tile(k_dim, tk, 128)

    grid = (m_dim // tm, n_dim // tn, k_dim // tk)

    out2d = pl.pallas_call(
        _proj_kernel,
        out_shape=jax.ShapeDtypeStruct((m_dim, n_dim), x.dtype),
        grid_spec=pltpu.PrefetchScalarGridSpec(
            num_scalar_prefetch=0,
            grid=grid,
            in_specs=[
                pl.BlockSpec((tm, tk), lambda i, j, k: (i, k)),
                pl.BlockSpec((tn, tk), lambda i, j, k: (j, k)),
            ],
            out_specs=pl.BlockSpec((tm, tn), lambda i, j, k: (i, j)),
            scratch_shapes=[pltpu.VMEM((tm, tn), jnp.float32)],
        ),
        compiler_params=pltpu.CompilerParams(
            dimension_semantics=("parallel", "parallel", "arbitrary"),
        ),
    )(x2d, w)

    return out2d.reshape(*lead, n_dim)


if __name__ == "__main__":
    key = jax.random.PRNGKey(0)
    kx, kw = jax.random.split(key)

    # FPN dense features: (batch, H, W, in_dim), projected to out_dim.
    B, H, W, IN_DIM, OUT_DIM = 2, 16, 16, 32, 64
    x = jax.random.normal(kx, (B, H, W, IN_DIM), dtype=jnp.float32)
    # nn.Linear weight with init 'normal'(mean=0, std=0.01), shape (out_dim, in_dim).
    w = 0.01 * jax.random.normal(kw, (OUT_DIM, IN_DIM), dtype=jnp.float32)

    out = jax.block_until_ready(conv_distill_proj(x, w))

    # Pure-JAX reference: y = x @ W^T (bias-free linear projection).
    ref = jnp.einsum("bhwk,nk->bhwn", x, w, precision=jax.lax.Precision.HIGHEST)
    assert out.shape == ref.shape
    assert jnp.allclose(out, ref, atol=2e-3, rtol=2e-3), "mismatch vs reference"

    print("KERNEL_OK")
</pallas_src>

<mosaic_0001>
module attributes {stable_mosaic.version = 11 : i64} {
  func.func @_proj_kernel(%arg0: i32, %arg1: i32, %arg2: i32, %arg3: memref<256x32xf32, #tpu.memory_space<vmem>>, %arg4: memref<64x32xf32, #tpu.memory_space<vmem>>, %arg5: memref<256x64xf32, #tpu.memory_space<vmem>>, %arg6: memref<256x64xf32, #tpu.memory_space<vmem>>) attributes {dimension_semantics = [#tpu.dimension_semantics<parallel>, #tpu.dimension_semantics<parallel>, #tpu.dimension_semantics<arbitrary>], iteration_bounds = array<i64: 2, 1, 1>, scalar_prefetch = 0 : i64, scratch_operands = 1 : i64, tpu.core_type = #tpu.core_type<tc>, window_params = [{transform_indices = @transform_0, window_bounds = array<i64: 256, 32>}, {transform_indices = @transform_1, window_bounds = array<i64: 64, 32>}, {transform_indices = @transform_2, window_bounds = array<i64: 256, 64>}]} {
    %c0_i32 = arith.constant 0 : i32
    %0 = arith.cmpi eq, %arg2, %c0_i32 : i32
    %1 = arith.extui %0 : i1 to i32
    %c0_i32_0 = arith.constant 0 : i32
    %2 = arith.cmpi ne, %1, %c0_i32_0 : i32
    scf.if %2 {
      %cst_10 = arith.constant 0.000000e+00 : f32
      %12 = vector.broadcast %cst_10 : f32 to vector<256x64xf32>
      %c0_11 = arith.constant 0 : index
      %c0_12 = arith.constant 0 : index
      %13 = vector.load %arg6[%c0_11, %c0_12] : memref<256x64xf32, #tpu.memory_space<vmem>>, vector<256x64xf32>
      tpu.vector_store %arg6[%c0_11, %c0_12], %12 {strides = array<i32>} : memref<256x64xf32, #tpu.memory_space<vmem>>, vector<256x64xf32>,
    } else {
    }
    %c0 = arith.constant 0 : index
    %c0_1 = arith.constant 0 : index
    %3 = vector.load %arg6[%c0, %c0_1] : memref<256x64xf32, #tpu.memory_space<vmem>>, vector<256x64xf32>
    %c0_2 = arith.constant 0 : index
    %c0_3 = arith.constant 0 : index
    %4 = vector.load %arg3[%c0_2, %c0_3] : memref<256x32xf32, #tpu.memory_space<vmem>>, vector<256x32xf32>
    %c0_4 = arith.constant 0 : index
    %c0_5 = arith.constant 0 : index
    %5 = vector.load %arg4[%c0_4, %c0_5] : memref<64x32xf32, #tpu.memory_space<vmem>>, vector<64x32xf32>
    %cst = arith.constant dense<0.000000e+00> : vector<256x64xf32>
    %6 = tpu.matmul %4, %5, %cst {dimension_numbers = #tpu.dot_dimension_numbers<[1], [1], [0], [0], [0, 0, 1, 0], [], []>} : vector<256x32xf32>, vector<64x32xf32>, vector<256x64xf32> -> vector<256x64xf32>
    %7 = arith.addf %3, %6 : vector<256x64xf32>
    %c0_6 = arith.constant 0 : index
    %c0_7 = arith.constant 0 : index
    %8 = vector.load %arg6[%c0_6, %c0_7] : memref<256x64xf32, #tpu.memory_space<vmem>>, vector<256x64xf32>
    tpu.vector_store %arg6[%c0_6, %c0_7], %7 {strides = array<i32>} : memref<256x64xf32, #tpu.memory_space<vmem>>, vector<256x64xf32>,
    %c0_i32_8 = arith.constant 0 : i32
    %9 = arith.cmpi eq, %arg2, %c0_i32_8 : i32
    %10 = arith.extui %9 : i1 to i32
    %c0_i32_9 = arith.constant 0 : i32
    %11 = arith.cmpi ne, %10, %c0_i32_9 : i32
    scf.if %11 {
      %c0_10 = arith.constant 0 : index
      %c0_11 = arith.constant 0 : index
      %12 = vector.load %arg6[%c0_10, %c0_11] : memref<256x64xf32, #tpu.memory_space<vmem>>, vector<256x64xf32>
      %c0_12 = arith.constant 0 : index
      %c0_13 = arith.constant 0 : index
      %13 = vector.load %arg5[%c0_12, %c0_13] : memref<256x64xf32, #tpu.memory_space<vmem>>, vector<256x64xf32>
      tpu.vector_store %arg5[%c0_12, %c0_13], %12 {strides = array<i32>} : memref<256x64xf32, #tpu.memory_space<vmem>>, vector<256x64xf32>,
    } else {
    }
    return
  }
  func.func @transform_0(%arg0: i32, %arg1: i32, %arg2: i32) -> (i32, i32) {
    %c0_i32 = arith.constant 0 : i32
    return %arg0, %arg2 : i32, i32
  }
  func.func @transform_1(%arg0: i32, %arg1: i32, %arg2: i32) -> (i32, i32) {
    %c0_i32 = arith.constant 0 : i32
    return %arg1, %arg2 : i32, i32
  }
  func.func @transform_2(%arg0: i32, %arg1: i32, %arg2: i32) -> (i32, i32) {
    %c0_i32 = arith.constant 0 : i32
    return %arg0, %arg1 : i32, i32
  }
}

</mosaic_0001>

<bundles_post_ra>
// kernel: tpu_custom_call.1
= control target key start
LH: loop header
LB: loop body
LE: loop exit
PB: predicated region body
PF: predicated region fallthrough
CT: control target
= control target key end

     0   :  { %s933_s9 = smov 0   ;;  %s935_s10 = smov 0   ;;  %s1260_s0 = inlined_call_operand.vmem [shape: f32[512,32], index: 0, kind: input, shape index: {}]   ;;  %s1261_s1 = inlined_call_operand.vmem [shape: f32[64,32], index: 1, kind: input, shape index: {}]   ;;  %s1262_s2 = inlined_call_operand.vmem [shape: f32[512,64], index: 2, kind: output, shape index: {}]  }
   0x1   :  { %s937_s11 = smov 0  }
   0x2 LB: > { %s31_s12 = sadd.s32 1, %s911_s10  ;;  %p797_p0 = scmp.ge.s32.totalorder %s915_s11, 1  ;;  %s915_s11 = sphi %s937_s11, %s12_s11   ;;  %s911_s10 = sphi %s935_s10, %s1264_s10   ;;  %s907_s9 = sphi %s933_s9, %s1263_s9  }
   0x3   : > { %p33_p1 = scmp.ge.s32.totalorder %s31_s12, 2  ;;  %p155_p2 = scmp.lt.s32.totalorder %s915_s11, 3 }
   0x5   : > { %s1266_s12 = smov (%p33_p1, %s31_s12), 0  ;;  %p156_p3 = pnand %p797_p0, %p155_p2 }
   0x6   : > { %s798_s21 = sshll.u32 (!%p156_p3), %s907_s9, 5 }
   0x7   : > { %159 = sbr.rel (%p156_p3) target bundleno = 246 (0xf6), region = 28  ;;  %p192_p4 = scmp.lt.s32.totalorder (!%p156_p3), %s798_s21, 63 }
   0xc   : > { %v326_v0 = vld [vmem:[%s1261_s1 + $0x38] sm:$0xff]  ;;  %vm327_vm0 = vcmask 261120   ;;  %v325_v1 = vld [vmem:[%s1261_s1 + $0x30] sm:$0xff]  ;;  %v324_v2 = vld [vmem:[%s1261_s1 + $0x28] sm:$0xff]  ;;  %s1268_s21 = smov (!%p192_p4, %s798_s21), 63  ;;  %vm222_vm1 = vcmask 523264  }
   0xd   : > { %845 = vmatpush.xpose.msk.msra.mxu2 %vm327_vm0, %v326_v0  ;;  %846 = vmatpush.xpose.msk.msra.mxu3 %vm327_vm0, %v326_v0  ;;  %v323_v3 = vld [vmem:[%s1261_s1 + $0x20] sm:$0xff]  ;;  %v322_v4 = vld [vmem:[%s1261_s1 + $0x18] sm:$0xff]  ;;  %v321_v5 = vld [vmem:[%s1261_s1 + $0x10] sm:$0xff]  ;;  %s799_s28 = sshll.u32 %s1268_s21, 3  ;;  %v917_v24 = vmov 0.0  }
   0xe   : > { %802 = vmatpush.xpose.msk.msra.mxu0 %vm327_vm0, %v326_v0  ;;  %844 = vmatpush.xpose.msk.msra.mxu1 %vm327_vm0, %v326_v0  ;;  %v320_v6 = vld [vmem:[%s1261_s1 + $0x8] sm:$0xff]  ;;  %v319_v7 = vld [vmem:[%s1261_s1] sm:$0xff]  ;;  %s1014_s5 = scalar_lea.vmem %s1260_s0, %s799_s28  ;;  %223 = vst.msk [vmem:[#allocation2] sm:$0xff] %vm222_vm1, %v917_v24  ;;  %s1155_s8 = scalar_lea.vmem %s1262_s2, %s799_s28 }
   0xf   : > { %v303_v8 = vld [vmem:[%s1014_s5 + $0x80] sm:$0xff]  ;;  %v304_v12 = vld [vmem:[%s1014_s5 + $0x88] sm:$0xff]  ;;  %v305_v16 = vld [vmem:[%s1014_s5 + $0x90] sm:$0xff]  ;;  %224 = vst.msk [vmem:[#allocation2 + $0x8] sm:$0xff] %vm222_vm1, %v917_v24 }
  0x10   : > { %v311_v9 = vld [vmem:[%s1014_s5 + $0xc0] sm:$0xff]  ;;  %v312_v13 = vld [vmem:[%s1014_s5 + $0xc8] sm:$0xff]  ;;  %v313_v17 = vld [vmem:[%s1014_s5 + $0xd0] sm:$0xff]  ;;  %225 = vst.msk [vmem:[#allocation2 + $0x10] sm:$0xff] %vm222_vm1, %v917_v24 }
  0x11   : > { %848 = vmatpush.xpose.msk.msra.mxu2 %vm327_vm0, %v325_v1  ;;  %849 = vmatpush.xpose.msk.msra.mxu3 %vm327_vm0, %v325_v1  ;;  %v287_v10 = vld [vmem:[%s1014_s5] sm:$0xff]  ;;  %v288_v14 = vld [vmem:[%s1014_s5 + $0x8] sm:$0xff]  ;;  %v289_v18 = vld [vmem:[%s1014_s5 + $0x10] sm:$0xff]  ;;  %226 = vst.msk [vmem:[#allocation2 + $0x18] sm:$0xff] %vm222_vm1, %v917_v24 }
  0x12   : > { %803 = vmatpush.xpose.msk.msra.mxu0 %vm327_vm0, %v325_v1  ;;  %847 = vmatpush.xpose.msk.msra.mxu1 %vm327_vm0, %v325_v1  ;;  %v295_v11 = vld [vmem:[%s1014_s5 + $0x40] sm:$0xff]  ;;  %v296_v15 = vld [vmem:[%s1014_s5 + $0x48] sm:$0xff]  ;;  %v297_v19 = vld [vmem:[%s1014_s5 + $0x50] sm:$0xff]  ;;  %227 = vst.msk [vmem:[#allocation2 + $0x20] sm:$0xff] %vm222_vm1, %v917_v24 }
  0x13   : > { %v306_v20 = vld [vmem:[%s1014_s5 + $0x98] sm:$0xff]  ;;  %v307_v25 = vld [vmem:[%s1014_s5 + $0xa0] sm:$0xff]  ;;  %228 = vst.msk [vmem:[#allocation2 + $0x28] sm:$0xff] %vm222_vm1, %v917_v24  ;;  %v308_v29 = vld [vmem:[%s1014_s5 + $0xa8] sm:$0xff] }
  0x14   : > { %v314_v21 = vld [vmem:[%s1014_s5 + $0xd8] sm:$0xff]  ;;  %v315_v26 = vld [vmem:[%s1014_s5 + $0xe0] sm:$0xff]  ;;  %229 = vst.msk [vmem:[#allocation2 + $0x30] sm:$0xff] %vm222_vm1, %v917_v24  ;;  %v316_v30 = vld [vmem:[%s1014_s5 + $0xe8] sm:$0xff] }
  0x15   : > { %851 = vmatpush.xpose.msk.msra.mxu2 %vm327_vm0, %v324_v2  ;;  %852 = vmatpush.xpose.msk.msra.mxu3 %vm327_vm0, %v324_v2  ;;  %v290_v22 = vld [vmem:[%s1014_s5 + $0x18] sm:$0xff]  ;;  %v291_v27 = vld [vmem:[%s1014_s5 + $0x20] sm:$0xff]  ;;  %230 = vst.msk [vmem:[#allocation2 + $0x38] sm:$0xff] %vm222_vm1, %v917_v24  ;;  %v292_v31 = vld [vmem:[%s1014_s5 + $0x28] sm:$0xff] }
  0x16   : > { %804 = vmatpush.xpose.msk.msra.mxu0 %vm327_vm0, %v324_v2  ;;  %850 = vmatpush.xpose.msk.msra.mxu1 %vm327_vm0, %v324_v2  ;;  %v298_v23 = vld [vmem:[%s1014_s5 + $0x58] sm:$0xff]  ;;  %v299_v28 = vld [vmem:[%s1014_s5 + $0x60] sm:$0xff]  ;;  %231 = vst.msk [vmem:[#allocation2 + $0x40] sm:$0xff] %vm222_vm1, %v917_v24  ;;  %v300_v32 = vld [vmem:[%s1014_s5 + $0x68] sm:$0xff] }
  0x17   : > { %232 = vst.msk [vmem:[#allocation2 + $0x48] sm:$0xff] %vm222_vm1, %v917_v24  ;;  %v309_v33 = vld [vmem:[%s1014_s5 + $0xb0] sm:$0xff]  ;;  %v310_v37 = vld [vmem:[%s1014_s5 + $0xb8] sm:$0xff]  ;;  %v255_v41 = vld [vmem:[#allocation2] sm:$0xff] }
  0x18   : > { %233 = vst.msk [vmem:[#allocation2 + $0x50] sm:$0xff] %vm222_vm1, %v917_v24  ;;  %v317_v34 = vld [vmem:[%s1014_s5 + $0xf0] sm:$0xff]  ;;  %v318_v38 = vld [vmem:[%s1014_s5 + $0xf8] sm:$0xff]  ;;  %v256_v53 = vld [vmem:[#allocation2 + $0x8] sm:$0xff] }
  0x19   : > { %854 = vmatpush.xpose.msk.msra.mxu2 %vm327_vm0, %v323_v3  ;;  %855 = vmatpush.xpose.msk.msra.mxu3 %vm327_vm0, %v323_v3  ;;  %234 = vst.msk [vmem:[#allocation2 + $0x58] sm:$0xff] %vm222_vm1, %v917_v24  ;;  %v293_v35 = vld [vmem:[%s1014_s5 + $0x30] sm:$0xff]  ;;  %v294_v39 = vld [vmem:[%s1014_s5 + $0x38] sm:$0xff] }
  0x1a   : > { %805 = vmatpush.xpose.msk.msra.mxu0 %vm327_vm0, %v323_v3  ;;  %853 = vmatpush.xpose.msk.msra.mxu1 %vm327_vm0, %v323_v3  ;;  %235 = vst.msk [vmem:[#allocation2 + $0x60] sm:$0xff] %vm222_vm1, %v917_v24  ;;  %v301_v36 = vld [vmem:[%s1014_s5 + $0x70] sm:$0xff]  ;;  %v302_v40 = vld [vmem:[%s1014_s5 + $0x78] sm:$0xff] }
  0x1b   : > { %236 = vst.msk [vmem:[#allocation2 + $0x68] sm:$0xff] %vm222_vm1, %v917_v24  ;;  %v257_v2 = vld [vmem:[#allocation2 + $0x10] sm:$0xff] }
  0x1c   : > { %237 = vst.msk [vmem:[#allocation2 + $0x70] sm:$0xff] %vm222_vm1, %v917_v24 }
  0x1d   : > { %857 = vmatpush.xpose.msk.msra.mxu2 %vm327_vm0, %v322_v4  ;;  %858 = vmatpush.xpose.msk.msra.mxu3 %vm327_vm0, %v322_v4  ;;  %238 = vst.msk [vmem:[#allocation2 + $0x78] sm:$0xff] %vm222_vm1, %v917_v24  ;;  %v263_v42 = vld [vmem:[#allocation2 + $0x40] sm:$0xff] }
  0x1e   : > { %806 = vmatpush.xpose.msk.msra.mxu0 %vm327_vm0, %v322_v4  ;;  %856 = vmatpush.xpose.msk.msra.mxu1 %vm327_vm0, %v322_v4  ;;  %239 = vst.msk [vmem:[#allocation2 + $0x80] sm:$0xff] %vm222_vm1, %v917_v24  ;;  %v264_v54 = vld [vmem:[#allocation2 + $0x48] sm:$0xff] }
  0x1f   : > { %240 = vst.msk [vmem:[#allocation2 + $0x88] sm:$0xff] %vm222_vm1, %v917_v24 }
  0x20   : > { %241 = vst.msk [vmem:[#allocation2 + $0x90] sm:$0xff] %vm222_vm1, %v917_v24 }
  0x21   : > { %860 = vmatpush.xpose.msk.msra.mxu2 %vm327_vm0, %v321_v5  ;;  %861 = vmatpush.xpose.msk.msra.mxu3 %vm327_vm0, %v321_v5  ;;  %242 = vst.msk [vmem:[#allocation2 + $0x98] sm:$0xff] %vm222_vm1, %v917_v24 }
  0x22   : > { %807 = vmatpush.xpose.msk.msra.mxu0 %vm327_vm0, %v321_v5  ;;  %859 = vmatpush.xpose.msk.msra.mxu1 %vm327_vm0, %v321_v5  ;;  %243 = vst.msk [vmem:[#allocation2 + $0xa0] sm:$0xff] %vm222_vm1, %v917_v24 }
  0x23   : > { %244 = vst.msk [vmem:[#allocation2 + $0xa8] sm:$0xff] %vm222_vm1, %v917_v24 }
  0x24   : > { %245 = vst.msk [vmem:[#allocation2 + $0xb0] sm:$0xff] %vm222_vm1, %v917_v24 }
  0x25   : > { %863 = vmatpush.xpose.msk.msra.mxu2 %vm327_vm0, %v320_v6  ;;  %864 = vmatpush.xpose.msk.msra.mxu3 %vm327_vm0, %v320_v6  ;;  %246 = vst.msk [vmem:[#allocation2 + $0xb8] sm:$0xff] %vm222_vm1, %v917_v24  ;;  %v271_v47 = vld [vmem:[#allocation2 + $0x80] sm:$0xff] }
  0x26   : > { %808 = vmatpush.xpose.msk.msra.mxu0 %vm327_vm0, %v320_v6  ;;  %862 = vmatpush.xpose.msk.msra.mxu1 %vm327_vm0, %v320_v6  ;;  %247 = vst.msk [vmem:[#allocation2 + $0xc0] sm:$0xff] %vm222_vm1, %v917_v24  ;;  %v272_v61 = vld [vmem:[#allocation2 + $0x88] sm:$0xff] }
  0x27   : > { %248 = vst.msk [vmem:[#allocation2 + $0xc8] sm:$0xff] %vm222_vm1, %v917_v24 }
  0x28   : > { %249 = vst.msk [vmem:[#allocation2 + $0xd0] sm:$0xff] %vm222_vm1, %v917_v24 }
  0x29   : > { %866 = vmatpush.xpose.msk.msra.mxu2 %vm327_vm0, %v319_v7  ;;  %867 = vmatpush.xpose.msk.msra.mxu3 %vm327_vm0, %v319_v7  ;;  %250 = vst.msk [vmem:[#allocation2 + $0xd8] sm:$0xff] %vm222_vm1, %v917_v24 }
  0x2a   : > { %809 = vmatpush.xpose.msk.msra.mxu0 %vm327_vm0, %v319_v7  ;;  %865 = vmatpush.xpose.msk.msra.mxu1 %vm327_vm0, %v319_v7  ;;  %251 = vst.msk [vmem:[#allocation2 + $0xe0] sm:$0xff] %vm222_vm1, %v917_v24  ;;  %v265_v7 = vld [vmem:[#allocation2 + $0x50] sm:$0xff] }
  0x2b   : > { %252 = vst.msk [vmem:[#allocation2 + $0xe8] sm:$0xff] %vm222_vm1, %v917_v24 }
  0x2c   : > { %826 = vmatmul.msk.f32.vlgmr.msra.gmra.mxu2 %vm327_vm0, %v303_v8  ;;  %834 = vmatmul.msk.f32.vlgmr.msra.gmra.mxu3 %vm327_vm0, %v311_v9  ;;  %253 = vst.msk [vmem:[#allocation2 + $0xf0] sm:$0xff] %vm222_vm1, %v917_v24 }
  0x2d   : > { %810 = vmatmul.msk.f32.vlgmr.msra.gmra.mxu0 %vm327_vm0, %v287_v10  ;;  %818 = vmatmul.msk.f32.vlgmr.msra.gmra.mxu1 %vm327_vm0, %v295_v11  ;;  %254 = vst.msk [vmem:[#allocation2 + $0xf8] sm:$0xff] %vm222_vm1, %v917_v24  ;;  %v279_v48 = vld [vmem:[#allocation2 + $0xc0] sm:$0xff]  ;;  %v273_v11 = vld [vmem:[#allocation2 + $0x90] sm:$0xff] }
  0x2e   : > { %v280_v62 = vld [vmem:[#allocation2 + $0xc8] sm:$0xff] }
  0x34   : > { %827 = vmatmul.msk.f32.gmra.mxu2 %vm327_vm0, %v304_v12  ;;  %835 = vmatmul.msk.f32.gmra.mxu3 %vm327_vm0, %v312_v13  ;;  %v281_v12 = vld [vmem:[#allocation2 + $0xd0] sm:$0xff] }
  0x35   : > { %811 = vmatmul.msk.f32.gmra.mxu0 %vm327_vm0, %v288_v14  ;;  %819 = vmatmul.msk.f32.gmra.mxu1 %vm327_vm0, %v296_v15 }
  0x3c   : > { %828 = vmatmul.msk.f32.gmra.mxu2 %vm327_vm0, %v305_v16  ;;  %836 = vmatmul.msk.f32.gmra.mxu3 %vm327_vm0, %v313_v17 }
  0x3d   : > { %812 = vmatmul.msk.f32.gmra.mxu0 %vm327_vm0, %v289_v18  ;;  %820 = vmatmul.msk.f32.gmra.mxu1 %vm327_vm0, %v297_v19  ;;  %v258_v19 = vld [vmem:[#allocation2 + $0x18] sm:$0xff] }
  0x44   : > { %829 = vmatmul.msk.f32.gmra.mxu2 %vm327_vm0, %v306_v20  ;;  %837 = vmatmul.msk.f32.gmra.mxu3 %vm327_vm0, %v314_v21  ;;  %v266_v20 = vld [vmem:[#allocation2 + $0x58] sm:$0xff] }
  0x45   : > { %813 = vmatmul.msk.f32.gmra.mxu0 %vm327_vm0, %v290_v22  ;;  %821 = vmatmul.msk.f32.gmra.mxu1 %vm327_vm0, %v298_v23 }
  0x4c   : > { %830 = vmatmul.msk.f32.gmra.mxu2 %vm327_vm0, %v307_v25  ;;  %838 = vmatmul.msk.f32.gmra.mxu3 %vm327_vm0, %v315_v26 }
  0x4d   : > { %814 = vmatmul.msk.f32.gmra.mxu0 %vm327_vm0, %v291_v27  ;;  %822 = vmatmul.msk.f32.gmra.mxu1 %vm327_vm0, %v299_v28  ;;  %v274_v28 = vld [vmem:[#allocation2 + $0x98] sm:$0xff] }
  0x54   : > { %831 = vmatmul.msk.f32.gmra.mxu2 %vm327_vm0, %v308_v29  ;;  %839 = vmatmul.msk.f32.gmra.mxu3 %vm327_vm0, %v316_v30  ;;  %v282_v29 = vld [vmem:[#allocation2 + $0xd8] sm:$0xff] }
  0x55   : > { %815 = vmatmul.msk.f32.gmra.mxu0 %vm327_vm0, %v292_v31  ;;  %823 = vmatmul.msk.f32.gmra.mxu1 %vm327_vm0, %v300_v32 }
  0x5c   : > { %832 = vmatmul.msk.f32.gmra.mxu2 %vm327_vm0, %v309_v33  ;;  %840 = vmatmul.msk.f32.gmra.mxu3 %vm327_vm0, %v317_v34  ;;  %v259_v34 = vld [vmem:[#allocation2 + $0x20] sm:$0xff] }
  0x5d   : > { %816 = vmatmul.msk.f32.gmra.mxu0 %vm327_vm0, %v293_v35  ;;  %824 = vmatmul.msk.f32.gmra.mxu1 %vm327_vm0, %v301_v36 }
  0x64   : > { %833 = vmatmul.msk.f32.gmra.mxu2 %vm327_vm0, %v310_v37  ;;  %841 = vmatmul.msk.f32.gmra.mxu3 %vm327_vm0, %v318_v38 }
  0x65   : > { %817 = vmatmul.msk.f32.gmra.mxu0 %vm327_vm0, %v294_v39  ;;  %825 = vmatmul.msk.f32.gmra.mxu1 %vm327_vm0, %v302_v40  ;;  %v267_v39 = vld [vmem:[#allocation2 + $0x60] sm:$0xff] }
  0xaa   : > { %v465_v43 = vpop.f32.mrf.mxu0  ;;  %v489_v44 = vpop.f32.mrf.mxu1 }
  0xab   : > { %v561_v45 = vadd.f32 %v465_v43, %v255_v41  ;;  %v569_v46 = vadd.f32 %v489_v44, %v263_v42  ;;  %v275_v43 = vld [vmem:[#allocation2 + $0xa0] sm:$0xff] }
  0xac   : > { %v283_v44 = vld [vmem:[#allocation2 + $0xe0] sm:$0xff] }
  0xad   : > { %594 = vst.msk [vmem:[#allocation2] sm:$0xff] %vm222_vm1, %v561_v45 }
  0xae   : > { %602 = vst.msk [vmem:[#allocation2 + $0x40] sm:$0xff] %vm222_vm1, %v569_v46 }
  0xaf   : > { %v513_v49 = vpop.f32.mrf.mxu2  ;;  %v537_v50 = vpop.f32.mrf.mxu3 }
  0xb0   : > { %v577_v51 = vadd.f32 %v513_v49, %v271_v47  ;;  %v585_v52 = vadd.f32 %v537_v50, %v279_v48 }
  0xb2   : > { %610 = vst.msk [vmem:[#allocation2 + $0x80] sm:$0xff] %vm222_vm1, %v577_v51  ;;  %v468_v55 = vpop.f32.mrf.mxu0  ;;  %v492_v56 = vpop.f32.mrf.mxu1  ;;  %v260_v51 = vld [vmem:[#allocation2 + $0x28] sm:$0xff] }
  0xb3   : > { %618 = vst.msk [vmem:[#allocation2 + $0xc0] sm:$0xff] %vm222_vm1, %v585_v52  ;;  %v562_v57 = vadd.f32 %v468_v55, %v256_v53  ;;  %v570_v59 = vadd.f32 %v492_v56, %v264_v54  ;;  %v268_v52 = vld [vmem:[#allocation2 + $0x68] sm:$0xff] }
  0xb4   : > { %v629_v58 = vld [vmem:[#allocation2] sm:$0xff] }
  0xb5   : > { %661 = vst.msk [vmem:[%s1155_s8] sm:$0xff] %vm222_vm1, %v629_v58  ;;  %v637_v60 = vld [vmem:[#allocation2 + $0x40] sm:$0xff] }
  0xb6   : > { %669 = vst.msk [vmem:[%s1155_s8 + $0x40] sm:$0xff] %vm222_vm1, %v637_v60  ;;  %v276_v60 = vld [vmem:[#allocation2 + $0xa8] sm:$0xff] }
  0xb7   : > { %595 = vst.msk [vmem:[#allocation2 + $0x8] sm:$0xff] %vm222_vm1, %v562_v57  ;;  %v516_v63 = vpop.f32.mrf.mxu2  ;;  %v540_v0 = vpop.f32.mrf.mxu3 }
  0xb8   : > { %603 = vst.msk [vmem:[#allocation2 + $0x48] sm:$0xff] %vm222_vm1, %v570_v59  ;;  %v578_v1 = vadd.f32 %v516_v63, %v272_v61  ;;  %v586_v4 = vadd.f32 %v540_v0, %v280_v62  ;;  %v284_v61 = vld [vmem:[#allocation2 + $0xe8] sm:$0xff] }
  0xb9   : > { %v645_v3 = vld [vmem:[#allocation2 + $0x80] sm:$0xff] }
  0xba   : > { %677 = vst.msk [vmem:[%s1155_s8 + $0x80] sm:$0xff] %vm222_vm1, %v645_v3  ;;  %v653_v5 = vld [vmem:[#allocation2 + $0xc0] sm:$0xff]  ;;  %v471_v6 = vpop.f32.mrf.mxu0  ;;  %v495_v8 = vpop.f32.mrf.mxu1 }
  0xbb   : > { %685 = vst.msk [vmem:[%s1155_s8 + $0xc0] sm:$0xff] %vm222_vm1, %v653_v5  ;;  %v563_v9 = vadd.f32 %v471_v6, %v257_v2  ;;  %v571_v10 = vadd.f32 %v495_v8, %v265_v7  ;;  %v261_v2 = vld [vmem:[#allocation2 + $0x30] sm:$0xff] }
  0xbc   : > { %611 = vst.msk [vmem:[#allocation2 + $0x88] sm:$0xff] %vm222_vm1, %v578_v1  ;;  %v269_v7 = vld [vmem:[#allocation2 + $0x70] sm:$0xff] }
  0xbd   : > { %619 = vst.msk [vmem:[#allocation2 + $0xc8] sm:$0xff] %vm222_vm1, %v586_v4 }
  0xbe   : > { %v630_v13 = vld [vmem:[#allocation2 + $0x8] sm:$0xff]  ;;  %596 = vst.msk [vmem:[#allocation2 + $0x10] sm:$0xff] %vm222_vm1, %v563_v9 }
  0xbf   : > { %662 = vst.msk [vmem:[%s1155_s8 + $0x8] sm:$0xff] %vm222_vm1, %v630_v13  ;;  %v638_v14 = vld [vmem:[#allocation2 + $0x48] sm:$0xff]  ;;  %v519_v15 = vpop.f32.mrf.mxu2  ;;  %v543_v16 = vpop.f32.mrf.mxu3 }
  0xc0   : > { %670 = vst.msk [vmem:[%s1155_s8 + $0x48] sm:$0xff] %vm222_vm1, %v638_v14  ;;  %v579_v17 = vadd.f32 %v519_v15, %v273_v11  ;;  %v587_v18 = vadd.f32 %v543_v16, %v281_v12  ;;  %v277_v11 = vld [vmem:[#allocation2 + $0xb0] sm:$0xff] }
  0xc1   : > { %604 = vst.msk [vmem:[#allocation2 + $0x50] sm:$0xff] %vm222_vm1, %v571_v10  ;;  %v285_v12 = vld [vmem:[#allocation2 + $0xf0] sm:$0xff] }
  0xc2   : > { %612 = vst.msk [vmem:[#allocation2 + $0x90] sm:$0xff] %vm222_vm1, %v579_v17  ;;  %v474_v21 = vpop.f32.mrf.mxu0  ;;  %v498_v22 = vpop.f32.mrf.mxu1 }
  0xc3   : > { %v646_v23 = vld [vmem:[#allocation2 + $0x88] sm:$0xff]  ;;  %620 = vst.msk [vmem:[#allocation2 + $0xd0] sm:$0xff] %vm222_vm1, %v587_v18  ;;  %v564_v24 = vadd.f32 %v474_v21, %v258_v19  ;;  %v572_v26 = vadd.f32 %v498_v22, %v266_v20  ;;  %v262_v19 = vld [vmem:[#allocation2 + $0x38] sm:$0xff] }
  0xc4   : > { %678 = vst.msk [vmem:[%s1155_s8 + $0x88] sm:$0xff] %vm222_vm1, %v646_v23  ;;  %v654_v25 = vld [vmem:[#allocation2 + $0xc8] sm:$0xff]  ;;  %v270_v20 = vld [vmem:[#allocation2 + $0x78] sm:$0xff] }
  0xc5   : > { %686 = vst.msk [vmem:[%s1155_s8 + $0xc8] sm:$0xff] %vm222_vm1, %v654_v25  ;;  %v631_v27 = vld [vmem:[#allocation2 + $0x10] sm:$0xff] }
  0xc6   : > { %663 = vst.msk [vmem:[%s1155_s8 + $0x10] sm:$0xff] %vm222_vm1, %v631_v27 }
  0xc7   : > { %597 = vst.msk [vmem:[#allocation2 + $0x18] sm:$0xff] %vm222_vm1, %v564_v24  ;;  %v522_v30 = vpop.f32.mrf.mxu2  ;;  %v546_v31 = vpop.f32.mrf.mxu3 }
  0xc8   : > { %v639_v32 = vld [vmem:[#allocation2 + $0x50] sm:$0xff]  ;;  %605 = vst.msk [vmem:[#allocation2 + $0x58] sm:$0xff] %vm222_vm1, %v572_v26  ;;  %v580_v33 = vadd.f32 %v522_v30, %v274_v28  ;;  %v588_v36 = vadd.f32 %v546_v31, %v282_v29  ;;  %v278_v28 = vld [vmem:[#allocation2 + $0xb8] sm:$0xff] }
  0xc9   : > { %671 = vst.msk [vmem:[%s1155_s8 + $0x50] sm:$0xff] %vm222_vm1, %v639_v32  ;;  %v647_v35 = vld [vmem:[#allocation2 + $0x90] sm:$0xff]  ;;  %v286_v29 = vld [vmem:[#allocation2 + $0xf8] sm:$0xff] }
  0xca   : > { %679 = vst.msk [vmem:[%s1155_s8 + $0x90] sm:$0xff] %vm222_vm1, %v647_v35  ;;  %v655_v37 = vld [vmem:[#allocation2 + $0xd0] sm:$0xff]  ;;  %v477_v38 = vpop.f32.mrf.mxu0  ;;  %v501_v40 = vpop.f32.mrf.mxu1 }
  0xcb   : > { %687 = vst.msk [vmem:[%s1155_s8 + $0xd0] sm:$0xff] %vm222_vm1, %v655_v37  ;;  %v565_v41 = vadd.f32 %v477_v38, %v259_v34  ;;  %v573_v42 = vadd.f32 %v501_v40, %v267_v39 }
  0xcc   : > { %613 = vst.msk [vmem:[#allocation2 + $0x98] sm:$0xff] %vm222_vm1, %v580_v33 }
  0xcd   : > { %621 = vst.msk [vmem:[#allocation2 + $0xd8] sm:$0xff] %vm222_vm1, %v588_v36 }
  0xce   : > { %v632_v45 = vld [vmem:[#allocation2 + $0x18] sm:$0xff]  ;;  %598 = vst.msk [vmem:[#allocation2 + $0x20] sm:$0xff] %vm222_vm1, %v565_v41 }
  0xcf   : > { %664 = vst.msk [vmem:[%s1155_s8 + $0x18] sm:$0xff] %vm222_vm1, %v632_v45  ;;  %v640_v46 = vld [vmem:[#allocation2 + $0x58] sm:$0xff]  ;;  %v525_v47 = vpop.f32.mrf.mxu2  ;;  %v549_v48 = vpop.f32.mrf.mxu3 }
  0xd0   : > { %672 = vst.msk [vmem:[%s1155_s8 + $0x58] sm:$0xff] %vm222_vm1, %v640_v46  ;;  %v581_v49 = vadd.f32 %v525_v47, %v275_v43  ;;  %v589_v50 = vadd.f32 %v549_v48, %v283_v44 }
  0xd1   : > { %606 = vst.msk [vmem:[#allocation2 + $0x60] sm:$0xff] %vm222_vm1, %v573_v42 }
  0xd2   : > { %614 = vst.msk [vmem:[#allocation2 + $0xa0] sm:$0xff] %vm222_vm1, %v581_v49  ;;  %v480_v53 = vpop.f32.mrf.mxu0  ;;  %v504_v54 = vpop.f32.mrf.mxu1 }
  0xd3   : > { %v648_v55 = vld [vmem:[#allocation2 + $0x98] sm:$0xff]  ;;  %622 = vst.msk [vmem:[#allocation2 + $0xe0] sm:$0xff] %vm222_vm1, %v589_v50  ;;  %v566_v56 = vadd.f32 %v480_v53, %v260_v51  ;;  %v574_v58 = vadd.f32 %v504_v54, %v268_v52 }
  0xd4   : > { %680 = vst.msk [vmem:[%s1155_s8 + $0x98] sm:$0xff] %vm222_vm1, %v648_v55  ;;  %v656_v57 = vld [vmem:[#allocation2 + $0xd8] sm:$0xff] }
  0xd5   : > { %688 = vst.msk [vmem:[%s1155_s8 + $0xd8] sm:$0xff] %vm222_vm1, %v656_v57  ;;  %v633_v59 = vld [vmem:[#allocation2 + $0x20] sm:$0xff] }
  0xd6   : > { %665 = vst.msk [vmem:[%s1155_s8 + $0x20] sm:$0xff] %vm222_vm1, %v633_v59 }
  0xd7   : > { %599 = vst.msk [vmem:[#allocation2 + $0x28] sm:$0xff] %vm222_vm1, %v566_v56  ;;  %v528_v62 = vpop.f32.mrf.mxu2  ;;  %v552_v63 = vpop.f32.mrf.mxu3 }
  0xd8   : > { %v641_v0 = vld [vmem:[#allocation2 + $0x60] sm:$0xff]  ;;  %607 = vst.msk [vmem:[#allocation2 + $0x68] sm:$0xff] %vm222_vm1, %v574_v58  ;;  %v582_v1 = vadd.f32 %v528_v62, %v276_v60  ;;  %v590_v4 = vadd.f32 %v552_v63, %v284_v61 }
  0xd9   : > { %673 = vst.msk [vmem:[%s1155_s8 + $0x60] sm:$0xff] %vm222_vm1, %v641_v0  ;;  %v649_v3 = vld [vmem:[#allocation2 + $0xa0] sm:$0xff] }
  0xda   : > { %681 = vst.msk [vmem:[%s1155_s8 + $0xa0] sm:$0xff] %vm222_vm1, %v649_v3  ;;  %v657_v5 = vld [vmem:[#allocation2 + $0xe0] sm:$0xff]  ;;  %v483_v6 = vpop.f32.mrf.mxu0  ;;  %v507_v8 = vpop.f32.mrf.mxu1 }
  0xdb   : > { %689 = vst.msk [vmem:[%s1155_s8 + $0xe0] sm:$0xff] %vm222_vm1, %v657_v5  ;;  %v567_v9 = vadd.f32 %v483_v6, %v261_v2  ;;  %v575_v10 = vadd.f32 %v507_v8, %v269_v7 }
  0xdc   : > { %615 = vst.msk [vmem:[#allocation2 + $0xa8] sm:$0xff] %vm222_vm1, %v582_v1 }
  0xdd   : > { %623 = vst.msk [vmem:[#allocation2 + $0xe8] sm:$0xff] %vm222_vm1, %v590_v4 }
  0xde   : > { %v634_v13 = vld [vmem:[#allocation2 + $0x28] sm:$0xff]  ;;  %600 = vst.msk [vmem:[#allocation2 + $0x30] sm:$0xff] %vm222_vm1, %v567_v9 }
  0xdf   : > { %666 = vst.msk [vmem:[%s1155_s8 + $0x28] sm:$0xff] %vm222_vm1, %v634_v13  ;;  %v642_v14 = vld [vmem:[#allocation2 + $0x68] sm:$0xff]  ;;  %v531_v15 = vpop.f32.mrf.mxu2  ;;  %v555_v16 = vpop.f32.mrf.mxu3 }
  0xe0   : > { %674 = vst.msk [vmem:[%s1155_s8 + $0x68] sm:$0xff] %vm222_vm1, %v642_v14  ;;  %v583_v17 = vadd.f32 %v531_v15, %v277_v11  ;;  %v591_v18 = vadd.f32 %v555_v16, %v285_v12 }
  0xe1   : > { %608 = vst.msk [vmem:[#allocation2 + $0x70] sm:$0xff] %vm222_vm1, %v575_v10 }
  0xe2   : > { %616 = vst.msk [vmem:[#allocation2 + $0xb0] sm:$0xff] %vm222_vm1, %v583_v17  ;;  %v486_v21 = vpop.f32.mrf.mxu0  ;;  %v510_v22 = vpop.f32.mrf.mxu1 }
  0xe3   : > { %v650_v23 = vld [vmem:[#allocation2 + $0xa8] sm:$0xff]  ;;  %624 = vst.msk [vmem:[#allocation2 + $0xf0] sm:$0xff] %vm222_vm1, %v591_v18  ;;  %v568_v24 = vadd.f32 %v486_v21, %v262_v19  ;;  %v576_v26 = vadd.f32 %v510_v22, %v270_v20 }
  0xe4   : > { %682 = vst.msk [vmem:[%s1155_s8 + $0xa8] sm:$0xff] %vm222_vm1, %v650_v23  ;;  %v658_v25 = vld [vmem:[#allocation2 + $0xe8] sm:$0xff] }
  0xe5   : > { %690 = vst.msk [vmem:[%s1155_s8 + $0xe8] sm:$0xff] %vm222_vm1, %v658_v25  ;;  %v635_v27 = vld [vmem:[#allocation2 + $0x30] sm:$0xff] }
  0xe6   : > { %667 = vst.msk [vmem:[%s1155_s8 + $0x30] sm:$0xff] %vm222_vm1, %v635_v27 }
  0xe7   : > { %601 = vst.msk [vmem:[#allocation2 + $0x38] sm:$0xff] %vm222_vm1, %v568_v24  ;;  %v534_v30 = vpop.f32.mrf.mxu2  ;;  %v558_v31 = vpop.f32.mrf.mxu3 }
  0xe8   : > { %v643_v32 = vld [vmem:[#allocation2 + $0x70] sm:$0xff]  ;;  %609 = vst.msk [vmem:[#allocation2 + $0x78] sm:$0xff] %vm222_vm1, %v576_v26  ;;  %v584_v33 = vadd.f32 %v534_v30, %v278_v28  ;;  %v592_v35 = vadd.f32 %v558_v31, %v286_v29 }
  0xe9   : > { %675 = vst.msk [vmem:[%s1155_s8 + $0x70] sm:$0xff] %vm222_vm1, %v643_v32  ;;  %v651_v34 = vld [vmem:[#allocation2 + $0xb0] sm:$0xff] }
  0xea   : > { %683 = vst.msk [vmem:[%s1155_s8 + $0xb0] sm:$0xff] %vm222_vm1, %v651_v34  ;;  %v659_v36 = vld [vmem:[#allocation2 + $0xf0] sm:$0xff] }
  0xeb   : > { %691 = vst.msk [vmem:[%s1155_s8 + $0xf0] sm:$0xff] %vm222_vm1, %v659_v36 }
  0xec   : > { %617 = vst.msk [vmem:[#allocation2 + $0xb8] sm:$0xff] %vm222_vm1, %v584_v33 }
  0xed   : > { %625 = vst.msk [vmem:[#allocation2 + $0xf8] sm:$0xff] %vm222_vm1, %v592_v35 }
  0xee   : > { %v636_v37 = vld [vmem:[#allocation2 + $0x38] sm:$0xff] }
  0xef   : > { %668 = vst.msk [vmem:[%s1155_s8 + $0x38] sm:$0xff] %vm222_vm1, %v636_v37  ;;  %v644_v38 = vld [vmem:[#allocation2 + $0x78] sm:$0xff] }
  0xf0   : > { %676 = vst.msk [vmem:[%s1155_s8 + $0x78] sm:$0xff] %vm222_vm1, %v644_v38 }
  0xf3   : > { %v652_v39 = vld [vmem:[#allocation2 + $0xb8] sm:$0xff] }
  0xf4   : > { %684 = vst.msk [vmem:[%s1155_s8 + $0xb8] sm:$0xff] %vm222_vm1, %v652_v39  ;;  %v660_v40 = vld [vmem:[#allocation2 + $0xf8] sm:$0xff] }
  0xf5   : > { %692 = vst.msk [vmem:[%s1155_s8 + $0xf8] sm:$0xff] %vm222_vm1, %v660_v40 }
  0xf6 PF: > { %s12_s11 = sadd.s32 1, %s915_s11   ;;  %s1263_s9 = smov %s911_s10 }
  0xf7   : > { %p9_p5 = scmp.ge.s32.totalorder %s12_s11, 4   ;;  %s1264_s10 = smov %s1266_s12 }
  0xf9   :  { %11 = sbr.rel (!%p9_p5) target bundleno = 2 (0x2), region = 69 }

</bundles_post_ra>
